<compile_context>
chip_gen: v6e
topology: v6e:2x2x1
jax: 0.10.0
libtpu: 0.0.40
codegen_flags: <defaults>
</compile_context>

<pallas_src>
import functools

import jax
import jax.numpy as jnp
from jax.experimental import pallas as pl
from jax.experimental.pallas import tpu as pltpu


def _outconv_kernel(x_ref, w_ref, b_ref, o_ref):
    # x_ref: (C_in, T)  pixels on the lane axis
    # w_ref: (C_out, C_in)
    # b_ref: (C_out, 1)
    # o_ref: (C_out, T)
    x = x_ref[...].astype(jnp.float32)
    w = w_ref[...].astype(jnp.float32)
    b = b_ref[...].astype(jnp.float32)

    c_in = x.shape[0]
    # y[o, t] = b[o] + sum_c w[o, c] * x[c, t]   (unrolled VPU FMAs, f32 accum)
    y = b  # (C_out, 1), broadcasts on first add
    for c in range(c_in):
        y = y + w[:, c : c + 1] * x[c : c + 1, :]

    o_ref[...] = y.astype(o_ref.dtype)


@functools.partial(jax.jit, static_argnames=("tile_hw",))
def out_conv(x_nchw, weight, bias, tile_hw=8192):
    """1x1 Conv2d forward (same semantics as nn.Conv2d(in, out, kernel_size=1)).

    Args:
      x_nchw: (N, C_in, H, W) input (PyTorch NCHW convention).
      weight: (C_out, C_in, 1, 1) conv weight (PyTorch convention).
      bias:   (C_out,) conv bias.
    Returns:
      (N, C_out, H, W) output.
    """
    N, C_in, H, W = x_nchw.shape
    C_out = weight.shape[0]
    HW = H * W

    # Free reshape: NCHW -> (N, C_in, HW).  No transposes, no padding.
    x3 = x_nchw.reshape(N, C_in, HW)
    w2 = weight.reshape(C_out, C_in)
    b2 = bias.reshape(C_out, 1)

    # Pick the pixel tile: full HW if it fits in one block, otherwise a large
    # multiple of 128 (ragged last tile is handled by Pallas block masking).
    if HW <= tile_hw:
        blk_hw = HW
        grid_hw = 1
    else:
        blk_hw = max(128, (tile_hw // 128) * 128)
        grid_hw = pl.cdiv(HW, blk_hw)

    out3 = pl.pallas_call(
        _outconv_kernel,
        out_shape=jax.ShapeDtypeStruct((N, C_out, HW), x_nchw.dtype),
        grid=(N, grid_hw),
        in_specs=[
            # Batch dim squeezed out; kernel sees (C_in, blk_hw).
            pl.BlockSpec((None, C_in, blk_hw), lambda n, j: (n, 0, j)),
            # Constant index_map -> weight/bias not re-DMA'd between steps.
            pl.BlockSpec((C_out, C_in), lambda n, j: (0, 0)),
            pl.BlockSpec((C_out, 1), lambda n, j: (0, 0)),
        ],
        out_specs=pl.BlockSpec((None, C_out, blk_hw), lambda n, j: (n, 0, j)),
        compiler_params=pltpu.CompilerParams(
            dimension_semantics=("parallel", "parallel"),
        ),
    )(x3, w2, b2)

    # Free reshape back: (N, C_out, HW) -> NCHW.
    return out3.reshape(N, C_out, H, W)


if __name__ == "__main__":
    N, C_in, C_out, H, W = 2, 4, 3, 16, 16

    key = jax.random.PRNGKey(0)
    kx, kw, kb = jax.random.split(key, 3)

    x = jax.random.normal(kx, (N, C_in, H, W), dtype=jnp.float32)
    # Deterministic param init (shapes follow nn.Conv2d(in, out, kernel_size=1)).
    fan_in = C_in  # kernel_size = 1
    bound = 1.0 / jnp.sqrt(fan_in)
    weight = jax.random.uniform(
        kw, (C_out, C_in, 1, 1), minval=-bound, maxval=bound, dtype=jnp.float32
    )
    bias = jax.random.uniform(
        kb, (C_out,), minval=-bound, maxval=bound, dtype=jnp.float32
    )

    y = out_conv(x, weight, bias)
    jax.block_until_ready(y)

    # Reference check in plain JAX (1x1 conv == per-pixel channel matmul).
    y_ref = (
        jnp.einsum("nchw,oc->nohw", x, weight.reshape(C_out, C_in))
        + bias[None, :, None, None]
    )
    assert y.shape == (N, C_out, H, W)
    assert jnp.allclose(y, y_ref, atol=1e-5, rtol=1e-5)

    print("KERNEL_OK")
</pallas_src>

<mosaic_0001>
module attributes {stable_mosaic.version = 11 : i64} {
  func.func @_outconv_kernel(%arg0: i32, %arg1: i32, %arg2: memref<1x4x256xf32, #tpu.memory_space<vmem>>, %arg3: memref<3x4xf32, #tpu.memory_space<vmem>>, %arg4: memref<3x1xf32, #tpu.memory_space<vmem>>, %arg5: memref<1x3x256xf32, #tpu.memory_space<vmem>>) attributes {dimension_semantics = [#tpu.dimension_semantics<parallel>, #tpu.dimension_semantics<parallel>], iteration_bounds = array<i64: 2, 1>, scalar_prefetch = 0 : i64, scratch_operands = 0 : i64, tpu.core_type = #tpu.core_type<tc>, window_params = [{transform_indices = @transform_0, window_bounds = array<i64: 1, 4, 256>}, {pipeline_mode = #tpu.pipeline_mode<synchronous>, transform_indices = @transform_1, window_bounds = array<i64: 3, 4>}, {pipeline_mode = #tpu.pipeline_mode<synchronous>, transform_indices = @transform_2, window_bounds = array<i64: 3, 1>}, {transform_indices = @transform_3, window_bounds = array<i64: 1, 3, 256>}]} {
    %c0 = arith.constant 0 : index
    %c0_0 = arith.constant 0 : index
    %c0_1 = arith.constant 0 : index
    %0 = vector.load %arg2[%c0, %c0_0, %c0_1] : memref<1x4x256xf32, #tpu.memory_space<vmem>>, vector<1x4x256xf32>
    %1 = vector.shape_cast %0 : vector<1x4x256xf32> to vector<4x256xf32>
    %c0_2 = arith.constant 0 : index
    %c0_3 = arith.constant 0 : index
    %2 = vector.load %arg3[%c0_2, %c0_3] : memref<3x4xf32, #tpu.memory_space<vmem>>, vector<3x4xf32>
    %c0_4 = arith.constant 0 : index
    %c0_5 = arith.constant 0 : index
    %3 = vector.load %arg4[%c0_4, %c0_5] : memref<3x1xf32, #tpu.memory_space<vmem>>, vector<3x1xf32>
    %4 = vector.extract_strided_slice %2 {offsets = [0, 0], sizes = [3, 1], strides = [1, 1]} : vector<3x4xf32> to vector<3x1xf32>
    %5 = vector.extract_strided_slice %1 {offsets = [0, 0], sizes = [1, 256], strides = [1, 1]} : vector<4x256xf32> to vector<1x256xf32>
    %6 = vector.broadcast %4 : vector<3x1xf32> to vector<3x256xf32>
    %7 = vector.broadcast %5 : vector<1x256xf32> to vector<3x256xf32>
    %8 = arith.mulf %6, %7 : vector<3x256xf32>
    %9 = vector.broadcast %3 : vector<3x1xf32> to vector<3x256xf32>
    %10 = arith.addf %9, %8 : vector<3x256xf32>
    %11 = vector.extract_strided_slice %2 {offsets = [0, 1], sizes = [3, 1], strides = [1, 1]} : vector<3x4xf32> to vector<3x1xf32>
    %12 = vector.extract_strided_slice %1 {offsets = [1, 0], sizes = [1, 256], strides = [1, 1]} : vector<4x256xf32> to vector<1x256xf32>
    %13 = vector.broadcast %11 : vector<3x1xf32> to vector<3x256xf32>
    %14 = vector.broadcast %12 : vector<1x256xf32> to vector<3x256xf32>
    %15 = arith.mulf %13, %14 : vector<3x256xf32>
    %16 = arith.addf %10, %15 : vector<3x256xf32>
    %17 = vector.extract_strided_slice %2 {offsets = [0, 2], sizes = [3, 1], strides = [1, 1]} : vector<3x4xf32> to vector<3x1xf32>
    %18 = vector.extract_strided_slice %1 {offsets = [2, 0], sizes = [1, 256], strides = [1, 1]} : vector<4x256xf32> to vector<1x256xf32>
    %19 = vector.broadcast %17 : vector<3x1xf32> to vector<3x256xf32>
    %20 = vector.broadcast %18 : vector<1x256xf32> to vector<3x256xf32>
    %21 = arith.mulf %19, %20 : vector<3x256xf32>
    %22 = arith.addf %16, %21 : vector<3x256xf32>
    %23 = vector.extract_strided_slice %2 {offsets = [0, 3], sizes = [3, 1], strides = [1, 1]} : vector<3x4xf32> to vector<3x1xf32>
    %24 = vector.extract_strided_slice %1 {offsets = [3, 0], sizes = [1, 256], strides = [1, 1]} : vector<4x256xf32> to vector<1x256xf32>
    %25 = vector.broadcast %23 : vector<3x1xf32> to vector<3x256xf32>
    %26 = vector.broadcast %24 : vector<1x256xf32> to vector<3x256xf32>
    %27 = arith.mulf %25, %26 : vector<3x256xf32>
    %28 = arith.addf %22, %27 : vector<3x256xf32>
    %c0_6 = arith.constant 0 : index
    %c0_7 = arith.constant 0 : index
    %c0_8 = arith.constant 0 : index
    %29 = vector.load %arg5[%c0_6, %c0_7, %c0_8] : memref<1x3x256xf32, #tpu.memory_space<vmem>>, vector<1x3x256xf32>
    %30 = vector.shape_cast %29 : vector<1x3x256xf32> to vector<3x256xf32>
    %31 = vector.shape_cast %28 : vector<3x256xf32> to vector<1x3x256xf32>
    tpu.vector_store %arg5[%c0_6, %c0_7, %c0_8], %31 {strides = array<i32>} : memref<1x3x256xf32, #tpu.memory_space<vmem>>, vector<1x3x256xf32>,
    return
  }
  func.func @transform_0(%arg0: i32, %arg1: i32) -> (i32, i32, i32) {
    %c0_i32 = arith.constant 0 : i32
    %c0_i32_0 = arith.constant 0 : i32
    return %arg0, %c0_i32, %arg1 : i32, i32, i32
  }
  func.func @transform_1(%arg0: i32, %arg1: i32) -> (i32, i32) {
    %c0_i32 = arith.constant 0 : i32
    %c0_i32_0 = arith.constant 0 : i32
    %c0_i32_1 = arith.constant 0 : i32
    return %c0_i32, %c0_i32_0 : i32, i32
  }
  func.func @transform_2(%arg0: i32, %arg1: i32) -> (i32, i32) {
    %c0_i32 = arith.constant 0 : i32
    %c0_i32_0 = arith.constant 0 : i32
    %c0_i32_1 = arith.constant 0 : i32
    return %c0_i32, %c0_i32_0 : i32, i32
  }
  func.func @transform_3(%arg0: i32, %arg1: i32) -> (i32, i32, i32) {
    %c0_i32 = arith.constant 0 : i32
    %c0_i32_0 = arith.constant 0 : i32
    return %arg0, %c0_i32, %arg1 : i32, i32, i32
  }
}

</mosaic_0001>

<bundles_post_ra>
// kernel: out_conv.1
= control target key start
LH: loop header
LB: loop body
LE: loop exit
PB: predicated region body
PF: predicated region fallthrough
CT: control target
= control target key end

     0   :  { %s509_s12 = smov 0   ;;  %s511_s13 = smov 0   ;;  %s555_s0 = inlined_call_operand.vmem [shape: f32[2,4,256], index: 0, kind: input, shape index: {}]   ;;  %s556_s1 = inlined_call_operand.vmem [shape: f32[3,4], index: 1, kind: input, shape index: {}]   ;;  %s557_s2 = inlined_call_operand.vmem [shape: f32[3,1], index: 2, kind: input, shape index: {}]   ;;  %s558_s3 = inlined_call_operand.vmem [shape: f32[2,3,256], index: 3, kind: output, shape index: {}]  }
   0x1   :  { %s513_s14 = smov 0  }
   0x2 LB: > { %s25_s15 = sadd.s32 1, %s479_s13  ;;  %p420_p0 = scmp.ge.s32.totalorder %s483_s14, 1  ;;  %s483_s14 = sphi %s513_s14, %s13_s14   ;;  %s479_s13 = sphi %s511_s13, %s560_s13   ;;  %s475_s12 = sphi %s509_s12, %s559_s12  }
   0x3   : > { %p27_p1 = scmp.ge.s32.totalorder %s25_s15, 2  ;;  %p158_p2 = scmp.lt.s32.totalorder %s483_s14, 3 }
   0x5   : > { %s562_s15 = smov (%p27_p1, %s25_s15), 0  ;;  %p159_p3 = pnand %p420_p0, %p158_p2 }
   0x6   : > { %p191_p4 = scmp.lt.s32.totalorder (!%p159_p3), %s475_s12, 1 }
   0x7   : > { %162 = sbr.rel (%p159_p3) target bundleno = 154 (0x9a), region = 32 }
   0xc   : > { %v211_v0 = vld [vmem:[%s556_s1] sm:$0x7]  ;;  %v485_v1 = vmov 0   ;;  %v486_v2 = vmov 1   ;;  %v487_v4 = vmov 2   ;;  %v488_v5 = vmov 3  }
   0xd   : > { %457 = vset.pattern.permute.xlu0 %v485_v1  ;;  %458 = vset.pattern.permute.xlu1 %v486_v2  ;;  %v212_v3 = vld [vmem:[%s557_s2] sm:$0x7]  ;;  %s564_s12 = smov (!%p191_p4, %s475_s12), 1  ;;  %v219_v6 = vlaneseq }
   0xe   : > { %215 = vperm.xlu0 %457, %v211_v0   ;;  %247 = vperm.xlu1 %458, %v211_v0   ;;  %s427_s20 = sshll.u32 %s564_s12, 3 }
   0xf   : > { %v220_v7 = vshrl.u32 %v219_v6, 7  ;;  %s198_s23 = scalar_lea.vmem %s555_s0, %s427_s20  ;;  %s208_s26 = scalar_lea.vmem %s558_s3, %s427_s20 }
  0x10   : > { %v210_v10 = vld [vmem:[%s198_s23] sm:$0xff] }
  0x11   : > { %v221_v8 = vsub.s32 0, %v220_v7  ;;  %v225_v9 = vsub.s32 4, %v220_v7  ;;  %v252_v11 = vsub.s32 1, %v220_v7  ;;  %v256_v12 = vsub.s32 5, %v220_v7 }
  0x12   : > { %241 = vperm.xlu0 %457, %v212_v3   ;;  %459 = vset.pattern.permute.xlu1 %v487_v4  ;;  %v278_v13 = vsub.s32 2, %v220_v7  ;;  %v282_v14 = vsub.s32 6, %v220_v7  ;;  %v304_v21 = vsub.s32 3, %v220_v7  ;;  %v308_v22 = vsub.s32 7, %v220_v7 }
  0x13   : > { %273 = vperm.xlu1 %459, %v211_v0   ;;  %v222_v15 = vrot.slane %v210_v10, %v221_v8  ;;  %v226_v16 = vrot.slane %v210_v10, %v225_v9  ;;  %v253_v17 = vrot.slane %v210_v10, %v252_v11  ;;  %v257_v18 = vrot.slane %v210_v10, %v256_v12 }
  0x14   : > { %v279_v19 = vrot.slane %v210_v10, %v278_v13  ;;  %v283_v20 = vrot.slane %v210_v10, %v282_v14  ;;  %v305_v31 = vrot.slane %v210_v10, %v304_v21  ;;  %v309_v32 = vrot.slane %v210_v10, %v308_v22 }
  0x15   : > { %v232_v23 = vrot.slane %v222_v15, %v221_v8  ;;  %v236_v24 = vrot.slane %v226_v16, %v221_v8  ;;  %v263_v27 = vrot.slane %v253_v17, %v252_v11  ;;  %v267_v28 = vrot.slane %v257_v18, %v252_v11 }
  0x16   : > { %460 = vset.pattern.permute.xlu0 %v488_v5  ;;  %v289_v29 = vrot.slane %v279_v19, %v278_v13  ;;  %v293_v30 = vrot.slane %v283_v20, %v278_v13  ;;  %v315_v43 = vrot.slane %v305_v31, %v304_v21  ;;  %v319_v44 = vrot.slane %v309_v32, %v304_v21 }
  0x17   : > { %299 = vperm.xlu0 %460, %v211_v0  }
  0x89   : > { %v216_v25 = vpop.permute.xlu0 %215  ;;  %v248_v26 = vpop.permute.xlu1 %247 }
  0x8a   : > { %v237_v33 = vmul.f32 %v232_v23, %v216_v25  ;;  %v238_v34 = vmul.f32 %v236_v24, %v216_v25  ;;  %v268_v36 = vmul.f32 %v263_v27, %v248_v26  ;;  %v269_v37 = vmul.f32 %v267_v28, %v248_v26 }
  0x8d   : > { %v242_v35 = vpop.permute.xlu0 %241 }
  0x8e   : > { %v244_v38 = vadd.f32 %v242_v35, %v237_v33  ;;  %v245_v39 = vadd.f32 %v242_v35, %v238_v34  ;;  %v274_v40 = vpop.permute.xlu1 %273 }
  0x8f   : > { %v294_v41 = vmul.f32 %v289_v29, %v274_v40  ;;  %v295_v42 = vmul.f32 %v293_v30, %v274_v40 }
  0x90   : > { %v270_v45 = vadd.f32 %v268_v36, %v244_v38  ;;  %v271_v46 = vadd.f32 %v269_v37, %v245_v39 }
  0x92   : > { %v296_v47 = vadd.f32 %v294_v41, %v270_v45  ;;  %v297_v48 = vadd.f32 %v295_v42, %v271_v46  ;;  %v300_v49 = vpop.permute.xlu0 %299 }
  0x93   : > { %v320_v50 = vmul.f32 %v315_v43, %v300_v49  ;;  %v321_v51 = vmul.f32 %v319_v44, %v300_v49 }
  0x95   : > { %v322_v52 = vadd.f32 %v320_v50, %v296_v47  ;;  %v323_v53 = vadd.f32 %v321_v51, %v297_v48 }
  0x97   : > { %v326_v54 = vcombine.low %v322_v52, %v323_v53 }
  0x99   : > { %328 = vst [vmem:[%s208_s26] sm:$0x77] %v326_v54 }
  0x9a PF: > { %s13_s14 = sadd.s32 1, %s483_s14   ;;  %s559_s12 = smov %s479_s13 }
  0x9b   : > { %p10_p5 = scmp.ge.s32.totalorder %s13_s14, 4   ;;  %s560_s13 = smov %s562_s15 }
  0x9d   :  { %12 = sbr.rel (!%p10_p5) target bundleno = 2 (0x2), region = 62 }

</bundles_post_ra>
